<compile_context>
chip_gen: v7x
topology: tpu7x:2x2x1
jax: 0.10.0
libtpu: 0.0.40
codegen_flags: <defaults>
</compile_context>

<pallas_src>
import functools

import jax
import jax.numpy as jnp
from jax import lax
from jax.experimental import pallas as pl
from jax.experimental.pallas import tpu as pltpu

_LANES = 128
# Target bytes for one (block_b, tile_cols) input block (double-buffered by
# the BlockSpec pipeline => ~8 MiB of VMEM for the input stream).
_TARGET_BLOCK_BYTES = 4 * 1024 * 1024


def _dtype_min(dtype):
    dtype = jnp.dtype(dtype)
    if jnp.issubdtype(dtype, jnp.floating):
        return float("-inf")
    return int(jnp.iinfo(dtype).min)  # uint min == 0, also the max-identity


def _rowmax_kernel(x_ref, o_ref, acc_ref, *, n_chunks, chunk_w, k_mask_start,
                   n_cols, tile_cols, tiles_per_split, num_col_tiles, acc_min):
    """Grid = (batch_blocks, n_splits, tiles_per_split).

    Each step folds one (block_b, tile_cols) slab into a lane-parallel
    (block_b, chunk_w) running max (elementwise vmax on the VPU).  The single
    cross-lane (XLU) reduce + lane broadcast happens once per (row block,
    split) on the last reduction step; the wrapper folds per-split partials.
    """
    s = pl.program_id(1)
    j = pl.program_id(2)

    @pl.when(j == 0)
    def _init():
        acc_ref[...] = jnp.full(acc_ref.shape, acc_min, acc_ref.dtype)

    # Global column offset of this tile.  Matches the (clamped) input
    # index_map; duplicate reads of the final tile (uneven split) are harmless
    # because max is idempotent.
    col_tile = jnp.minimum(s * tiles_per_split + j, num_col_tiles - 1)
    col0 = col_tile * tile_cols

    acc = acc_ref[...]

    def _fold(k, a):
        start = pl.multiple_of(k * chunk_w, chunk_w)
        return jnp.maximum(a, x_ref[:, pl.ds(start, chunk_w)])

    # Chunks [0, k_mask_start) can never reach past column n_cols for any
    # tile -> plain unmasked fold.
    if k_mask_start > 0:
        acc = lax.fori_loop(0, k_mask_start, _fold, acc,
                            unroll=min(8, k_mask_start))

    # Chunks [k_mask_start, n_chunks) may overhang the array on the last
    # column tile: out-of-range lanes are replaced with the max-identity.
    if k_mask_start < n_chunks:
        lane = lax.broadcasted_iota(jnp.int32, acc.shape, 1)  # hoisted

        def _masked_fold(k, a):
            start = pl.multiple_of(k * chunk_w, chunk_w)
            chunk = x_ref[:, pl.ds(start, chunk_w)]
            limit = n_cols - col0 - k * chunk_w          # scalar-unit math
            return jnp.maximum(a, jnp.where(lane < limit, chunk, acc_min))

        acc = lax.fori_loop(k_mask_start, n_chunks, _masked_fold, acc,
                            unroll=min(8, n_chunks - k_mask_start))

    acc_ref[...] = acc

    @pl.when(j == pl.num_programs(2) - 1)
    def _finalize():
        # One cross-lane (XLU) reduce per (row block, split), then lane
        # broadcast so the output block is a full unmasked lane-dense store.
        rowmax = jnp.max(acc_ref[...], axis=-1, keepdims=True)
        o_ref[...] = jnp.broadcast_to(rowmax, o_ref.shape).astype(o_ref.dtype)


@jax.jit
def tree_based_max_pooling(x):
    """x: (B, ...) -> (B,), out[b] = max over all elements of x[b]."""
    orig_dtype = x.dtype
    if x.dtype == jnp.bool_:
        x = x.astype(jnp.uint8)          # max == logical or; cast back below

    B = x.shape[0]
    # NOTE: with TPU tiled layouts this reshape can introduce a relayout copy
    # in XLA for >2-D inputs with small trailing dims; feed a flat (B, N)
    # array from the producer when possible (max is permutation invariant).
    x2 = x if x.ndim == 2 else x.reshape(B, -1)
    N = x2.shape[1]
    dtype = x2.dtype
    itemsize = jnp.dtype(dtype).itemsize
    acc_min = _dtype_min(dtype)

    # ---- Row (batch) blocking: multiples of the sublane count, never larger
    # than B (tail rows of an edge block are sliced away; no padding copy).
    sub = {4: 8, 2: 16, 1: 32}.get(itemsize, 8)
    block_b = B if B < sub else min(8 * sub, (B // sub) * sub)

    # ---- Column (reduction) tiling: large 128-aligned tiles sized so one
    # input block is ~4 MiB; column tail handled by in-kernel masking.
    if N < _LANES:
        tile_cols = N                     # == full dim -> valid BlockSpec
        chunk_w = N
    else:
        chunk_w = _LANES
        max_cols = (N // _LANES) * _LANES
        budget_cols = max(_LANES,
                          _TARGET_BLOCK_BYTES // (block_b * itemsize)
                          // _LANES * _LANES)
        tile_cols = min(max_cols, budget_cols)
        if tile_cols == max_cols and B >= sub:
            # Rows are short: recover the ~4 MiB/step DMA target by packing
            # more rows per block (acc stays <= 32 f32 vregs).
            rows_budget = max(sub, _TARGET_BLOCK_BYTES
                              // (tile_cols * itemsize) // sub * sub)
            block_b = min(32 * sub, (B // sub) * sub, max(block_b, rows_budget))

    num_b_blocks = pl.cdiv(B, block_b)
    b_ceil = num_b_blocks * block_b
    num_tiles = pl.cdiv(N, tile_cols)

    n_chunks = tile_cols // chunk_w
    rem_cols = N - (num_tiles - 1) * tile_cols        # in (0, tile_cols]
    k_mask_start = n_chunks if rem_cols == tile_cols else rem_cols // chunk_w

    # ---- Split the reduction into independent partials when the batch axis
    # has a single block so both TensorCores get work on v7x (megacore).
    n_splits = 2 if (num_b_blocks == 1 and num_tiles >= 2) else 1
    tiles_per_split = pl.cdiv(num_tiles, n_splits)

    kernel = functools.partial(
        _rowmax_kernel,
        n_chunks=n_chunks, chunk_w=chunk_w, k_mask_start=k_mask_start,
        n_cols=N, tile_cols=tile_cols, tiles_per_split=tiles_per_split,
        num_col_tiles=num_tiles, acc_min=acc_min)

    out = pl.pallas_call(
        kernel,
        out_shape=jax.ShapeDtypeStruct((b_ceil, n_splits * _LANES), dtype),
        grid_spec=pltpu.PrefetchScalarGridSpec(
            num_scalar_prefetch=0,
            grid=(num_b_blocks, n_splits, tiles_per_split),
            in_specs=[pl.BlockSpec(
                (block_b, tile_cols),
                lambda b, s, j: (b, jnp.minimum(s * tiles_per_split + j,
                                                num_tiles - 1)))],
            # Output block resident across the reduction axis; written once on
            # the last reduction step (lane-dense, full unmasked stores).
            out_specs=pl.BlockSpec((block_b, _LANES), lambda b, s, j: (b, s)),
            scratch_shapes=[pltpu.VMEM((block_b, chunk_w), dtype)],
        ),
        compiler_params=pltpu.CompilerParams(
            dimension_semantics=("parallel", "parallel", "arbitrary")),
        cost_estimate=pl.CostEstimate(
            flops=0, transcendentals=0,
            bytes_accessed=B * N * itemsize
            + b_ceil * n_splits * _LANES * itemsize),
    )(x2)

    if n_splits == 1:
        result = out[:B, 0]                           # (B,)
    else:
        result = jnp.max(out[:B], axis=-1)            # fold per-split partials

    if orig_dtype == jnp.bool_:
        result = result.astype(jnp.bool_)
    return result


if __name__ == "__main__":
    key = jax.random.PRNGKey(0)

    # Main case, matching the module's expected (B, C, H, W) input.
    B, C, H, W = 2, 4, 16, 16
    x = jax.random.normal(key, (B, C, H, W), dtype=jnp.float32)
    y = jax.block_until_ready(tree_based_max_pooling(x))
    ref = jnp.max(x.reshape(B, -1), axis=1)
    assert y.shape == (B,), f"bad shape {y.shape}"
    assert y.dtype == x.dtype, f"bad dtype {y.dtype}"
    assert bool(jnp.allclose(y, ref)), f"mismatch: {y} vs {ref}"

    # Non-aligned N (exercises the in-kernel tail masking + split-N partials).
    k1, k2 = jax.random.split(key)
    x2 = jax.random.normal(k1, (3, 5, 37), dtype=jnp.float32)
    y2 = jax.block_until_ready(tree_based_max_pooling(x2))
    ref2 = jnp.max(x2.reshape(3, -1), axis=1)
    assert bool(jnp.allclose(y2, ref2)), f"mismatch: {y2} vs {ref2}"

    # bf16 path (accumulator stays in input dtype; max is exact).
    x3 = jax.random.normal(k2, (9, 300), dtype=jnp.bfloat16)
    y3 = jax.block_until_ready(tree_based_max_pooling(x3))
    ref3 = jnp.max(x3, axis=1)
    assert y3.dtype == jnp.bfloat16
    assert bool(jnp.allclose(y3.astype(jnp.float32), ref3.astype(jnp.float32)))

    print("KERNEL_OK")
</pallas_src>

<mosaic_0001>
module attributes {stable_mosaic.version = 11 : i64} {
  func.func @_rowmax_kernel(%arg0: i32, %arg1: i32, %arg2: i32, %arg3: memref<2x1024xf32, #tpu.memory_space<vmem>>, %arg4: memref<2x128xf32, #tpu.memory_space<vmem>>, %arg5: memref<2x128xf32, #tpu.memory_space<vmem>>) attributes {dimension_semantics = [#tpu.dimension_semantics<parallel>, #tpu.dimension_semantics<parallel>, #tpu.dimension_semantics<arbitrary>], iteration_bounds = array<i64: 1, 1, 1>, scalar_prefetch = 0 : i64, scratch_operands = 1 : i64, tpu.core_type = #tpu.core_type<tc>, window_params = [{transform_indices = @transform_0, window_bounds = array<i64: 2, 1024>}, {transform_indices = @transform_1, window_bounds = array<i64: 2, 128>}]} {
    %c0_i32 = arith.constant 0 : i32
    %0 = arith.cmpi eq, %arg2, %c0_i32 : i32
    %1 = arith.extui %0 : i1 to i32
    %c0_i32_0 = arith.constant 0 : i32
    %2 = arith.cmpi ne, %1, %c0_i32_0 : i32
    scf.if %2 {
      %cst = arith.constant 0xFF800000 : f32
      %48 = vector.broadcast %cst : f32 to vector<2x128xf32>
      %c0_22 = arith.constant 0 : index
      %c0_23 = arith.constant 0 : index
      %49 = vector.load %arg5[%c0_22, %c0_23] : memref<2x128xf32, #tpu.memory_space<vmem>>, vector<2x128xf32>
      tpu.vector_store %arg5[%c0_22, %c0_23], %48 {strides = array<i32>} : memref<2x128xf32, #tpu.memory_space<vmem>>, vector<2x128xf32>,
    } else {
    }
    %c0 = arith.constant 0 : index
    %c0_1 = arith.constant 0 : index
    %3 = vector.load %arg5[%c0, %c0_1] : memref<2x128xf32, #tpu.memory_space<vmem>>, vector<2x128xf32>
    %c0_i32_2 = arith.constant 0 : i32
    %c128_i32 = arith.constant 128 : i32
    %4 = arith.muli %c0_i32_2, %c128_i32 : i32
    %5 = tpu.assume_multiple %4, 128 : i32
    %c0_3 = arith.constant 0 : index
    %6 = arith.index_cast %5 : i32 to index
    %7 = vector.load %arg3[%c0_3, %6] : memref<2x1024xf32, #tpu.memory_space<vmem>>, vector<2x128xf32>
    %8 = arith.maximumf %3, %7 : vector<2x128xf32>
    %c1_i32 = arith.constant 1 : i32
    %c128_i32_4 = arith.constant 128 : i32
    %9 = arith.muli %c1_i32, %c128_i32_4 : i32
    %10 = tpu.assume_multiple %9, 128 : i32
    %c0_5 = arith.constant 0 : index
    %11 = arith.index_cast %10 : i32 to index
    %12 = vector.load %arg3[%c0_5, %11] : memref<2x1024xf32, #tpu.memory_space<vmem>>, vector<2x128xf32>
    %13 = arith.maximumf %8, %12 : vector<2x128xf32>
    %c2_i32 = arith.constant 2 : i32
    %c128_i32_6 = arith.constant 128 : i32
    %14 = arith.muli %c2_i32, %c128_i32_6 : i32
    %15 = tpu.assume_multiple %14, 128 : i32
    %c0_7 = arith.constant 0 : index
    %16 = arith.index_cast %15 : i32 to index
    %17 = vector.load %arg3[%c0_7, %16] : memref<2x1024xf32, #tpu.memory_space<vmem>>, vector<2x128xf32>
    %18 = arith.maximumf %13, %17 : vector<2x128xf32>
    %c3_i32 = arith.constant 3 : i32
    %c128_i32_8 = arith.constant 128 : i32
    %19 = arith.muli %c3_i32, %c128_i32_8 : i32
    %20 = tpu.assume_multiple %19, 128 : i32
    %c0_9 = arith.constant 0 : index
    %21 = arith.index_cast %20 : i32 to index
    %22 = vector.load %arg3[%c0_9, %21] : memref<2x1024xf32, #tpu.memory_space<vmem>>, vector<2x128xf32>
    %23 = arith.maximumf %18, %22 : vector<2x128xf32>
    %c4_i32 = arith.constant 4 : i32
    %c128_i32_10 = arith.constant 128 : i32
    %24 = arith.muli %c4_i32, %c128_i32_10 : i32
    %25 = tpu.assume_multiple %24, 128 : i32
    %c0_11 = arith.constant 0 : index
    %26 = arith.index_cast %25 : i32 to index
    %27 = vector.load %arg3[%c0_11, %26] : memref<2x1024xf32, #tpu.memory_space<vmem>>, vector<2x128xf32>
    %28 = arith.maximumf %23, %27 : vector<2x128xf32>
    %c5_i32 = arith.constant 5 : i32
    %c128_i32_12 = arith.constant 128 : i32
    %29 = arith.muli %c5_i32, %c128_i32_12 : i32
    %30 = tpu.assume_multiple %29, 128 : i32
    %c0_13 = arith.constant 0 : index
    %31 = arith.index_cast %30 : i32 to index
    %32 = vector.load %arg3[%c0_13, %31] : memref<2x1024xf32, #tpu.memory_space<vmem>>, vector<2x128xf32>
    %33 = arith.maximumf %28, %32 : vector<2x128xf32>
    %c6_i32 = arith.constant 6 : i32
    %c128_i32_14 = arith.constant 128 : i32
    %34 = arith.muli %c6_i32, %c128_i32_14 : i32
    %35 = tpu.assume_multiple %34, 128 : i32
    %c0_15 = arith.constant 0 : index
    %36 = arith.index_cast %35 : i32 to index
    %37 = vector.load %arg3[%c0_15, %36] : memref<2x1024xf32, #tpu.memory_space<vmem>>, vector<2x128xf32>
    %38 = arith.maximumf %33, %37 : vector<2x128xf32>
    %c7_i32 = arith.constant 7 : i32
    %c128_i32_16 = arith.constant 128 : i32
    %39 = arith.muli %c7_i32, %c128_i32_16 : i32
    %40 = tpu.assume_multiple %39, 128 : i32
    %c0_17 = arith.constant 0 : index
    %41 = arith.index_cast %40 : i32 to index
    %42 = vector.load %arg3[%c0_17, %41] : memref<2x1024xf32, #tpu.memory_space<vmem>>, vector<2x128xf32>
    %43 = arith.maximumf %38, %42 : vector<2x128xf32>
    %c8_i32 = arith.constant 8 : i32
    %c0_18 = arith.constant 0 : index
    %c0_19 = arith.constant 0 : index
    %44 = vector.load %arg5[%c0_18, %c0_19] : memref<2x128xf32, #tpu.memory_space<vmem>>, vector<2x128xf32>
    tpu.vector_store %arg5[%c0_18, %c0_19], %43 {strides = array<i32>} : memref<2x128xf32, #tpu.memory_space<vmem>>, vector<2x128xf32>,
    %c0_i32_20 = arith.constant 0 : i32
    %45 = arith.cmpi eq, %arg2, %c0_i32_20 : i32
    %46 = arith.extui %45 : i1 to i32
    %c0_i32_21 = arith.constant 0 : i32
    %47 = arith.cmpi ne, %46, %c0_i32_21 : i32
    scf.if %47 {
      %c0_22 = arith.constant 0 : index
      %c0_23 = arith.constant 0 : index
      %48 = vector.load %arg5[%c0_22, %c0_23] : memref<2x128xf32, #tpu.memory_space<vmem>>, vector<2x128xf32>
      %cst = arith.constant dense<0xFF800000> : vector<2xf32>
      %49 = vector.multi_reduction <maximumf>, %48, %cst [1] : vector<2x128xf32> to vector<2xf32>
      %50 = vector.shape_cast %49 : vector<2xf32> to vector<2x1xf32>
      %51 = vector.shape_cast %50 : vector<2x1xf32> to vector<2x1xf32>
      %52 = vector.broadcast %51 : vector<2x1xf32> to vector<2x128xf32>
      %c0_24 = arith.constant 0 : index
      %c0_25 = arith.constant 0 : index
      %53 = vector.load %arg4[%c0_24, %c0_25] : memref<2x128xf32, #tpu.memory_space<vmem>>, vector<2x128xf32>
      tpu.vector_store %arg4[%c0_24, %c0_25], %52 {strides = array<i32>} : memref<2x128xf32, #tpu.memory_space<vmem>>, vector<2x128xf32>,
    } else {
    }
    return
  }
  func.func @transform_0(%arg0: i32, %arg1: i32, %arg2: i32) -> (i32, i32) {
    %c1_i32 = arith.constant 1 : i32
    %0 = arith.muli %arg1, %c1_i32 : i32
    %1 = arith.addi %0, %arg2 : i32
    %c0_i32 = arith.constant 0 : i32
    %2 = arith.minsi %1, %c0_i32 : i32
    %c0_i32_0 = arith.constant 0 : i32
    return %arg0, %2 : i32, i32
  }
  func.func @transform_1(%arg0: i32, %arg1: i32, %arg2: i32) -> (i32, i32) {
    %c0_i32 = arith.constant 0 : i32
    return %arg0, %arg1 : i32, i32
  }
}

</mosaic_0001>

<bundles_post_ra>
// kernel: tree_based_max_pooling.1
= control target key start
LH: loop header
LB: loop body
LE: loop exit
PB: predicated region body
PF: predicated region fallthrough
CT: control target
= control target key end

     0   :  { %v97_v0 = vmov -inf   ;;  %vm74_vm0 = vcmask 1041408   ;;  %s135_s0 = inlined_call_operand.vmem [shape: f32[2,1024], index: 0, kind: input, shape index: {}]   ;;  %s136_s1 = inlined_call_operand.vmem [shape: f32[2,128], index: 1, kind: output, shape index: {}]  }
   0x1   :  { %44 = vst [vmem:[#allocation2] sm:$0x3] %v97_v0  ;;  %v46_v1 = vld [vmem:[%s135_s0] sm:$0x3]  ;;  %v89_v3 = vld [vmem:[%s135_s0 + $0x2] sm:$0x3] }
   0x2   :  { %v90_v5 = vld [vmem:[%s135_s0 + $0x4] sm:$0x3]  ;;  %v91_v7 = vld [vmem:[%s135_s0 + $0x6] sm:$0x3]  ;;  %v92_v9 = vld [vmem:[%s135_s0 + $0x8] sm:$0x3] }
   0x3   :  { %v93_v11 = vld [vmem:[%s135_s0 + $0xa] sm:$0x3]  ;;  %v94_v13 = vld [vmem:[%s135_s0 + $0xc] sm:$0x3]  ;;  %v95_v15 = vld [vmem:[%s135_s0 + $0xe] sm:$0x3] }
   0x8   :  { %v45_v2 = vld [vmem:[#allocation2] sm:$0x3] }
   0x9   :  { %v47_v4 = vmax.f32 %v45_v2, %v46_v1 }
   0xb   :  { %v50_v6 = vmax.f32 %v47_v4, %v89_v3 }
   0xd   :  { %v53_v8 = vmax.f32 %v50_v6, %v90_v5 }
   0xf   :  { %v56_v10 = vmax.f32 %v53_v8, %v91_v7 }
  0x11   :  { %v59_v12 = vmax.f32 %v56_v10, %v92_v9 }
  0x13   :  { %v62_v14 = vmax.f32 %v59_v12, %v93_v11 }
  0x15   :  { %v65_v16 = vmax.f32 %v62_v14, %v94_v13 }
  0x17   :  { %v68_v17 = vmax.f32 %v65_v16, %v95_v15 }
  0x19   :  { %69 = vst [vmem:[#allocation2] sm:$0x3] %v68_v17 }
  0x20   :  { %v73_v18 = vld [vmem:[#allocation2] sm:$0x3] }
  0x21   :  { %v75_v19 = vsel %vm74_vm0, %v73_v18, -inf }
  0x22   :  { %76 = vmax.xlane.f32.xlu0 %v75_v19 }
  0xaf   :  { %v77_v20 = vpop.xlane.xlu0 %76 }
  0xb0   :  { %78 = vst [vmem:[%s136_s1] sm:$0x3] %v77_v20 }

</bundles_post_ra>
